<compile_context>
chip_gen: v5e
topology: v5e:2x2
jax: 0.10.0
libtpu: 0.0.40
codegen_flags: <defaults>
</compile_context>

<pallas_src>
import functools
import jax
import jax.numpy as jnp
from jax.experimental import pallas as pl
from jax.experimental.pallas import tpu as pltpu


def _sigmoid(x):
    # Explicit form (exp + div) — guaranteed Mosaic lowering, fine for the
    # moderate pre-activation magnitudes seen here.
    return 1.0 / (1.0 + jnp.exp(-x))


# ---------------------------------------------------------------------------
# Fused kernel: whole STConvBlock, all batch elements, one invocation.
# Layouts (all 2-D, "all vertices' channels" on lanes):
#   x_ref  : (B*T1, Kt*N*Cin)   conv #1 im2col rows (pre-gathered in wrapper)
#   w1_ref : (Kt*N*Cin, 2*N*C0) block-diag conv #1 weight, columns = [p | q]
#   b1_ref : (1, 2*N*C0)
#   wg_ref : (N*C0, N*C1)       block-diag per-vertex Linear (HyperGraphConv)
#   bg_ref : (1, N*C1)
#   w2_ref : (Kt*N*C1, 2*N*C2)  block-diag conv #2 weight, columns = [p | q]
#   b2_ref : (1, 2*N*C2)
#   lng_ref, lnb_ref : (1, N*C2)  LayerNorm affine params, (N, C2) flattened
#   o_ref  : (B*T2, N*C2)       lane-dense output (N*C2 = 128 here)
# ---------------------------------------------------------------------------
def _stconv_kernel(x_ref, w1_ref, b1_ref, wg_ref, bg_ref, w2_ref, b2_ref,
                   lng_ref, lnb_ref, o_ref, *, B, T1, T2, Kt):
    n_c0 = wg_ref.shape[0]     # N*C0
    n_c2 = o_ref.shape[1]      # N*C2

    # ---- temporal conv #1 + GLU: single im2col MXU dot (K = Kt*N*Cin) ----
    # (Align residual already folded into the last temporal tap of w1.)
    y1 = jnp.dot(x_ref[...], w1_ref[...],
                 preferred_element_type=jnp.float32) + b1_ref[...]
    h1 = y1[:, :n_c0] * _sigmoid(y1[:, n_c0:])                  # (B*T1, N*C0)

    # ---- HyperGraphConv c_transform (per-vertex Linear) + ReLU ----
    # TODO(synk): HyperNet (the `gcn` inside HyperGraphConv) is undefined in
    # the reference source; it is treated as an identity map here.
    g = jnp.dot(h1, wg_ref[...],
                preferred_element_type=jnp.float32) + bg_ref[...]
    h = jnp.maximum(g, 0.0)                                     # (B*T1, N*C1)

    # ---- temporal conv #2 + GLU: in-kernel im2col + single MXU dot ----
    # Tap slices are static; lane concat of 128-wide pieces is lane-aligned.
    h_cat = jnp.concatenate(
        [jnp.concatenate(
            [h[b * T1 + kt: b * T1 + kt + T2, :] for kt in range(Kt)],
            axis=-1)
         for b in range(B)],
        axis=0)                                                 # (B*T2, Kt*N*C1)
    y2 = jnp.dot(h_cat, w2_ref[...],
                 preferred_element_type=jnp.float32) + b2_ref[...]
    h2 = y2[:, :n_c2] * _sigmoid(y2[:, n_c2:])                  # (B*T2, N*C2)

    # ---- LayerNorm over (n_vertex, C2): full-lane-width reduction per row ----
    mean = jnp.mean(h2, axis=-1, keepdims=True)
    d = h2 - mean
    var = jnp.mean(d * d, axis=-1, keepdims=True)
    y = d * jax.lax.rsqrt(var + 1e-5)
    o_ref[...] = (y * lng_ref[...] + lnb_ref[...]).astype(o_ref.dtype)


# ---------------------------------------------------------------------------
# Wrapper-side weight preprocessing.
# ---------------------------------------------------------------------------
def _fold_align_residual(w, c_in, c_out):
    # GLU: (x_p + Align(x)[t+Kt-1]) * sigmoid(x_q) with Align = identity /
    # channel zero-pad (c_in <= c_out), i.e. a fixed linear map added to the
    # last temporal tap's p-half — exact fold.
    if c_in > c_out:
        # TODO(synk): Align's learned 1x1-conv branch (c_in > c_out) is not
        # exercised by this configuration.
        raise NotImplementedError("Align with c_in > c_out not used here")
    idx = jnp.arange(c_in)
    p = jnp.zeros((c_in, 2 * c_out), w.dtype).at[idx, idx].set(1.0)
    return w.at[w.shape[0] - 1].add(p)


def _block_diag_vertex(w, n_vertex):
    # (..., c_in, c_out) per-vertex map -> (..., N*c_in, N*c_out) block-diag.
    eye = jnp.eye(n_vertex, dtype=w.dtype)
    bd = jnp.einsum('nm,...cd->...ncmd', eye, w)
    shape = w.shape[:-2] + (n_vertex * w.shape[-2], n_vertex * w.shape[-1])
    return bd.reshape(shape)


def _pack_conv_weight(w_eff, n_vertex):
    # (Kt, c_in, 2*c_out) -> (Kt*N*c_in, 2*N*c_out) with columns = [p | q].
    kt, c_in, two_c_out = w_eff.shape
    c_out = two_c_out // 2
    wp = _block_diag_vertex(w_eff[..., :c_out], n_vertex)   # (Kt, N*c_in, N*c_out)
    wq = _block_diag_vertex(w_eff[..., c_out:], n_vertex)
    w = jnp.concatenate([wp, wq], axis=-1)                   # (Kt, N*c_in, 2*N*c_out)
    return w.reshape(kt * n_vertex * c_in, 2 * n_vertex * c_out)


def _pack_conv_bias(b, n_vertex):
    c_out = b.shape[0] // 2
    return jnp.concatenate([jnp.tile(b[:c_out], n_vertex),
                            jnp.tile(b[c_out:], n_vertex)]).reshape(1, -1)


# ---------------------------------------------------------------------------
# Full STConvBlock forward (GLU activation, inference mode).
# ---------------------------------------------------------------------------
def st_conv_block(x_nchw, params, Kt):
    # x_nchw: (B, C_last, T, N) (PyTorch layout) -> (B, C2, T-2*(Kt-1), N)
    B, c_in, T, N = x_nchw.shape
    w1, w2, wg = params["conv1_w"], params["conv2_w"], params["graph_w"]
    C0 = w1.shape[-1] // 2
    C1 = wg.shape[-1]
    C2 = w2.shape[-1] // 2
    T1 = T - (Kt - 1)
    T2 = T1 - (Kt - 1)

    # Entry layout (once, in XLA): NCHW -> (B, T, N*Cin), then conv #1 im2col.
    x = jnp.transpose(x_nchw, (0, 2, 3, 1)).reshape(B, T, N * c_in)
    x_rows = jnp.concatenate([x[:, kt:kt + T1, :] for kt in range(Kt)],
                             axis=-1).reshape(B * T1, Kt * N * c_in)

    # Block-diagonal (per-vertex) weight packing; Align residuals folded.
    w1_bd = _pack_conv_weight(_fold_align_residual(w1, c_in, C0), N)
    w2_bd = _pack_conv_weight(_fold_align_residual(w2, C1, C2), N)
    wg_bd = _block_diag_vertex(wg, N)
    b1_bd = _pack_conv_bias(params["conv1_b"], N)
    b2_bd = _pack_conv_bias(params["conv2_b"], N)
    bg_bd = jnp.tile(params["graph_b"], N).reshape(1, N * C1)
    ln_g = params["ln_gamma"].reshape(1, N * C2)
    ln_b = params["ln_beta"].reshape(1, N * C2)

    # One invocation, no grid: whole problem is VMEM-resident (< 1 MiB here).
    # TODO(synk): for production-size N/T, add a T-tiling grid axis with a
    # (Kt-1) halo and revert to per-vertex (non-block-diag) weights (v7x has
    # only 64 MiB VMEM); keep grid=(B,) "parallel" there for the 2 TCs.
    vmem = pl.BlockSpec(memory_space=pltpu.MemorySpace.VMEM)
    out = pl.pallas_call(
        functools.partial(_stconv_kernel, B=B, T1=T1, T2=T2, Kt=Kt),
        out_shape=jax.ShapeDtypeStruct((B * T2, N * C2), x_nchw.dtype),
        in_specs=[vmem] * 9,
        out_specs=vmem,
    )(x_rows, w1_bd, b1_bd, wg_bd, bg_bd, w2_bd, b2_bd, ln_g, ln_b)

    # Exit layout: (B*T2, N*C2) -> (B, C2, T2, N)  (fused by XLA downstream).
    return jnp.transpose(out.reshape(B, T2, N, C2), (0, 3, 1, 2))


# ---------------------------------------------------------------------------
# Pure-JAX reference (for correctness validation only).
# ---------------------------------------------------------------------------
def st_conv_block_ref(x_nchw, params, Kt):
    x = jnp.transpose(x_nchw, (0, 2, 3, 1))                    # (B, T, N, Cin)
    B, T, N, Cin = x.shape
    w1, b1 = params["conv1_w"], params["conv1_b"]
    C0 = w1.shape[-1] // 2
    T1 = T - (Kt - 1)
    conv = b1 + sum(jnp.einsum("btnc,cd->btnd", x[:, kt:kt + T1], w1[kt])
                    for kt in range(Kt))
    x_in = jnp.pad(x[:, Kt - 1:], ((0, 0), (0, 0), (0, 0), (0, C0 - Cin)))
    h = (conv[..., :C0] + x_in) * jax.nn.sigmoid(conv[..., C0:])
    h = jnp.maximum(jnp.einsum("btnc,cd->btnd", h, params["graph_w"])
                    + params["graph_b"], 0.0)
    w2, b2 = params["conv2_w"], params["conv2_b"]
    C2 = w2.shape[-1] // 2
    T2 = T1 - (Kt - 1)
    conv2 = b2 + sum(jnp.einsum("btnc,cd->btnd", h[:, kt:kt + T2], w2[kt])
                     for kt in range(Kt))
    h2 = (conv2[..., :C2] + h[:, Kt - 1:]) * jax.nn.sigmoid(conv2[..., C2:])
    mean = jnp.mean(h2, axis=(2, 3), keepdims=True)
    var = jnp.mean((h2 - mean) ** 2, axis=(2, 3), keepdims=True)
    y = (h2 - mean) * jax.lax.rsqrt(var + 1e-5) * params["ln_gamma"] + params["ln_beta"]
    return jnp.transpose(y, (0, 3, 1, 2))


if __name__ == "__main__":
    # Small deterministic configuration: Kt=3, T=12, n_vertex=16,
    # last_block_channel=4, channels=[8, 8, 8]  (N * channels[2] = 128 lanes).
    B, T, N, Kt = 2, 12, 16, 3
    last_block_channel = 4
    channels = [8, 8, 8]

    key = jax.random.PRNGKey(0)
    ks = jax.random.split(key, 8)

    def init(k, shape, fan_in):
        bound = 1.0 / (fan_in ** 0.5)
        return jax.random.uniform(k, shape, jnp.float32, -bound, bound)

    params = {
        # CausalConv2d #1: weight (Kt, Cin, 2*Cout) (= PyTorch weight transposed)
        "conv1_w": init(ks[0], (Kt, last_block_channel, 2 * channels[0]),
                        last_block_channel * Kt),
        "conv1_b": init(ks[1], (2 * channels[0],), last_block_channel * Kt),
        # HyperGraphConv c_transform: Linear(channels[0] -> channels[1])
        "graph_w": init(ks[2], (channels[0], channels[1]), channels[0]),
        "graph_b": init(ks[3], (channels[1],), channels[0]),
        # CausalConv2d #2: weight (Kt, channels[1], 2*channels[2])
        "conv2_w": init(ks[4], (Kt, channels[1], 2 * channels[2]),
                        channels[1] * Kt),
        "conv2_b": init(ks[5], (2 * channels[2],), channels[1] * Kt),
        # LayerNorm([n_vertex, channels[2]])
        "ln_gamma": jnp.ones((N, channels[2]), jnp.float32),
        "ln_beta": jnp.zeros((N, channels[2]), jnp.float32),
    }

    x = jax.random.normal(ks[6], (B, last_block_channel, T, N), jnp.float32)

    fwd = jax.jit(functools.partial(st_conv_block, Kt=Kt))
    out = jax.block_until_ready(fwd(x, params))

    expected_T = T - 2 * (Kt - 1)
    assert out.shape == (B, channels[2], expected_T, N), out.shape
    assert bool(jnp.all(jnp.isfinite(out)))

    ref = st_conv_block_ref(x, params, Kt)
    max_err = float(jnp.max(jnp.abs(out - ref)))
    assert jnp.allclose(out, ref, atol=1e-4, rtol=1e-4), max_err

    print("KERNEL_OK")
</pallas_src>

<mosaic_0001>
module attributes {stable_mosaic.version = 11 : i64} {
  func.func @_stconv_kernel(%arg0: memref<20x192xf32, #tpu.memory_space<vmem>>, %arg1: memref<192x256xf32, #tpu.memory_space<vmem>>, %arg2: memref<1x256xf32, #tpu.memory_space<vmem>>, %arg3: memref<128x128xf32, #tpu.memory_space<vmem>>, %arg4: memref<1x128xf32, #tpu.memory_space<vmem>>, %arg5: memref<384x256xf32, #tpu.memory_space<vmem>>, %arg6: memref<1x256xf32, #tpu.memory_space<vmem>>, %arg7: memref<1x128xf32, #tpu.memory_space<vmem>>, %arg8: memref<1x128xf32, #tpu.memory_space<vmem>>, %arg9: memref<16x128xf32, #tpu.memory_space<vmem>>) attributes {dimension_semantics = [], scalar_prefetch = 0 : i64, scratch_operands = 0 : i64, tpu.core_type = #tpu.core_type<tc>} {
    %c0 = arith.constant 0 : index
    %c0_0 = arith.constant 0 : index
    %0 = vector.load %arg0[%c0, %c0_0] : memref<20x192xf32, #tpu.memory_space<vmem>>, vector<20x192xf32>
    %c0_1 = arith.constant 0 : index
    %c0_2 = arith.constant 0 : index
    %1 = vector.load %arg1[%c0_1, %c0_2] : memref<192x256xf32, #tpu.memory_space<vmem>>, vector<192x256xf32>
    %cst = arith.constant dense<0.000000e+00> : vector<20x256xf32>
    %2 = tpu.matmul %0, %1, %cst {dimension_numbers = #tpu.dot_dimension_numbers<[1], [0], [0], [1], [0, 0, 1, 1], [], []>} : vector<20x192xf32>, vector<192x256xf32>, vector<20x256xf32> -> vector<20x256xf32>
    %c0_3 = arith.constant 0 : index
    %c0_4 = arith.constant 0 : index
    %3 = vector.load %arg2[%c0_3, %c0_4] : memref<1x256xf32, #tpu.memory_space<vmem>>, vector<1x256xf32>
    %4 = vector.broadcast %3 : vector<1x256xf32> to vector<20x256xf32>
    %5 = arith.addf %2, %4 : vector<20x256xf32>
    %6 = vector.extract_strided_slice %5 {offsets = [0, 0], sizes = [20, 128], strides = [1, 1]} : vector<20x256xf32> to vector<20x128xf32>
    %7 = vector.extract_strided_slice %5 {offsets = [0, 128], sizes = [20, 128], strides = [1, 1]} : vector<20x256xf32> to vector<20x128xf32>
    %cst_5 = arith.constant 0.000000e+00 : f32
    %8 = vector.broadcast %cst_5 : f32 to vector<20x128xf32>
    %9 = arith.subf %8, %7 : vector<20x128xf32>
    %10 = math.exp %9 : vector<20x128xf32>
    %cst_6 = arith.constant 1.000000e+00 : f32
    %11 = vector.broadcast %cst_6 : f32 to vector<20x128xf32>
    %12 = arith.addf %11, %10 : vector<20x128xf32>
    %cst_7 = arith.constant 1.000000e+00 : f32
    %13 = vector.broadcast %cst_7 : f32 to vector<20x128xf32>
    %14 = arith.divf %13, %12 : vector<20x128xf32>
    %15 = arith.mulf %6, %14 : vector<20x128xf32>
    %c0_8 = arith.constant 0 : index
    %c0_9 = arith.constant 0 : index
    %16 = vector.load %arg3[%c0_8, %c0_9] : memref<128x128xf32, #tpu.memory_space<vmem>>, vector<128x128xf32>
    %cst_10 = arith.constant dense<0.000000e+00> : vector<20x128xf32>
    %17 = tpu.matmul %15, %16, %cst_10 {dimension_numbers = #tpu.dot_dimension_numbers<[1], [0], [0], [1], [0, 0, 1, 1], [], []>} : vector<20x128xf32>, vector<128x128xf32>, vector<20x128xf32> -> vector<20x128xf32>
    %c0_11 = arith.constant 0 : index
    %c0_12 = arith.constant 0 : index
    %18 = vector.load %arg4[%c0_11, %c0_12] : memref<1x128xf32, #tpu.memory_space<vmem>>, vector<1x128xf32>
    %19 = vector.broadcast %18 : vector<1x128xf32> to vector<20x128xf32>
    %20 = arith.addf %17, %19 : vector<20x128xf32>
    %cst_13 = arith.constant 0.000000e+00 : f32
    %21 = vector.broadcast %cst_13 : f32 to vector<20x128xf32>
    %22 = arith.maximumf %20, %21 : vector<20x128xf32>
    %23 = vector.extract_strided_slice %22 {offsets = [0, 0], sizes = [8, 128], strides = [1, 1]} : vector<20x128xf32> to vector<8x128xf32>
    %24 = vector.extract_strided_slice %22 {offsets = [1, 0], sizes = [8, 128], strides = [1, 1]} : vector<20x128xf32> to vector<8x128xf32>
    %25 = vector.extract_strided_slice %22 {offsets = [2, 0], sizes = [8, 128], strides = [1, 1]} : vector<20x128xf32> to vector<8x128xf32>
    %26 = tpu.concatenate %23, %24, %25 in 1 : vector<8x128xf32>, vector<8x128xf32>, vector<8x128xf32> -> vector<8x384xf32>
    %27 = vector.extract_strided_slice %22 {offsets = [10, 0], sizes = [8, 128], strides = [1, 1]} : vector<20x128xf32> to vector<8x128xf32>
    %28 = vector.extract_strided_slice %22 {offsets = [11, 0], sizes = [8, 128], strides = [1, 1]} : vector<20x128xf32> to vector<8x128xf32>
    %29 = vector.extract_strided_slice %22 {offsets = [12, 0], sizes = [8, 128], strides = [1, 1]} : vector<20x128xf32> to vector<8x128xf32>
    %30 = tpu.concatenate %27, %28, %29 in 1 : vector<8x128xf32>, vector<8x128xf32>, vector<8x128xf32> -> vector<8x384xf32>
    %31 = tpu.concatenate %26, %30 in 0 : vector<8x384xf32>, vector<8x384xf32> -> vector<16x384xf32>
    %c0_14 = arith.constant 0 : index
    %c0_15 = arith.constant 0 : index
    %32 = vector.load %arg5[%c0_14, %c0_15] : memref<384x256xf32, #tpu.memory_space<vmem>>, vector<384x256xf32>
    %cst_16 = arith.constant dense<0.000000e+00> : vector<16x256xf32>
    %33 = tpu.matmul %31, %32, %cst_16 {dimension_numbers = #tpu.dot_dimension_numbers<[1], [0], [0], [1], [0, 0, 1, 1], [], []>} : vector<16x384xf32>, vector<384x256xf32>, vector<16x256xf32> -> vector<16x256xf32>
    %c0_17 = arith.constant 0 : index
    %c0_18 = arith.constant 0 : index
    %34 = vector.load %arg6[%c0_17, %c0_18] : memref<1x256xf32, #tpu.memory_space<vmem>>, vector<1x256xf32>
    %35 = vector.broadcast %34 : vector<1x256xf32> to vector<16x256xf32>
    %36 = arith.addf %33, %35 : vector<16x256xf32>
    %37 = vector.extract_strided_slice %36 {offsets = [0, 0], sizes = [16, 128], strides = [1, 1]} : vector<16x256xf32> to vector<16x128xf32>
    %38 = vector.extract_strided_slice %36 {offsets = [0, 128], sizes = [16, 128], strides = [1, 1]} : vector<16x256xf32> to vector<16x128xf32>
    %cst_19 = arith.constant 0.000000e+00 : f32
    %39 = vector.broadcast %cst_19 : f32 to vector<16x128xf32>
    %40 = arith.subf %39, %38 : vector<16x128xf32>
    %41 = math.exp %40 : vector<16x128xf32>
    %cst_20 = arith.constant 1.000000e+00 : f32
    %42 = vector.broadcast %cst_20 : f32 to vector<16x128xf32>
    %43 = arith.addf %42, %41 : vector<16x128xf32>
    %cst_21 = arith.constant 1.000000e+00 : f32
    %44 = vector.broadcast %cst_21 : f32 to vector<16x128xf32>
    %45 = arith.divf %44, %43 : vector<16x128xf32>
    %46 = arith.mulf %37, %45 : vector<16x128xf32>
    %cst_22 = arith.constant dense<0.000000e+00> : vector<16xf32>
    %47 = vector.multi_reduction <add>, %46, %cst_22 [1] : vector<16x128xf32> to vector<16xf32>
    %48 = vector.shape_cast %47 : vector<16xf32> to vector<16x1xf32>
    %cst_23 = arith.constant 1.280000e+02 : f32
    %49 = vector.broadcast %cst_23 : f32 to vector<16x1xf32>
    %50 = arith.divf %48, %49 : vector<16x1xf32>
    %51 = vector.broadcast %50 : vector<16x1xf32> to vector<16x128xf32>
    %52 = arith.subf %46, %51 : vector<16x128xf32>
    %53 = arith.mulf %52, %52 : vector<16x128xf32>
    %cst_24 = arith.constant dense<0.000000e+00> : vector<16xf32>
    %54 = vector.multi_reduction <add>, %53, %cst_24 [1] : vector<16x128xf32> to vector<16xf32>
    %55 = vector.shape_cast %54 : vector<16xf32> to vector<16x1xf32>
    %cst_25 = arith.constant 1.280000e+02 : f32
    %56 = vector.broadcast %cst_25 : f32 to vector<16x1xf32>
    %57 = arith.divf %55, %56 : vector<16x1xf32>
    %cst_26 = arith.constant 9.99999974E-6 : f32
    %58 = vector.broadcast %cst_26 : f32 to vector<16x1xf32>
    %59 = arith.addf %57, %58 : vector<16x1xf32>
    %60 = math.rsqrt %59 : vector<16x1xf32>
    %61 = vector.broadcast %60 : vector<16x1xf32> to vector<16x128xf32>
    %62 = arith.mulf %52, %61 : vector<16x128xf32>
    %c0_27 = arith.constant 0 : index
    %c0_28 = arith.constant 0 : index
    %63 = vector.load %arg7[%c0_27, %c0_28] : memref<1x128xf32, #tpu.memory_space<vmem>>, vector<1x128xf32>
    %64 = vector.broadcast %63 : vector<1x128xf32> to vector<16x128xf32>
    %65 = arith.mulf %62, %64 : vector<16x128xf32>
    %c0_29 = arith.constant 0 : index
    %c0_30 = arith.constant 0 : index
    %66 = vector.load %arg8[%c0_29, %c0_30] : memref<1x128xf32, #tpu.memory_space<vmem>>, vector<1x128xf32>
    %67 = vector.broadcast %66 : vector<1x128xf32> to vector<16x128xf32>
    %68 = arith.addf %65, %67 : vector<16x128xf32>
    %c0_31 = arith.constant 0 : index
    %c0_32 = arith.constant 0 : index
    %69 = vector.load %arg9[%c0_31, %c0_32] : memref<16x128xf32, #tpu.memory_space<vmem>>, vector<16x128xf32>
    tpu.vector_store %arg9[%c0_31, %c0_32], %68 {strides = array<i32>} : memref<16x128xf32, #tpu.memory_space<vmem>>, vector<16x128xf32>,
    return
  }
}

</mosaic_0001>

<bundles_post_ra>
// kernel: tile.38
= control target key start
LH: loop header
LB: loop body
LE: loop exit
PB: predicated region body
PF: predicated region fallthrough
CT: control target
= control target key end

     0   :  { %s28_s0 = inlined_call_operand.vmem [shape: f32[8], index: 0, kind: input, shape index: {}]   ;;  %s29_s1 = inlined_call_operand.vmem [shape: f32[16,8], index: 1, kind: output, shape index: {}]  }
   0x1   :  { %v4_v0 = vld [vmem:[%s28_s0] ss:$0 sm:$0xff] }
   0x2   :  { %5 = vst [vmem:[%s29_s1] sm:$0xff] %v4_v0 }
   0x3   :  { %8 = vst [vmem:[%s29_s1 + $0x8] sm:$0xff] %v4_v0 }

// kernel: tile.39
= control target key start
LH: loop header
LB: loop body
LE: loop exit
PB: predicated region body
PF: predicated region fallthrough
CT: control target
= control target key end

     0   :  { %s131_s10 = smov 120   ;;  %s132_s11 = smov 104   ;;  %vm3_vm0 = vcmask 64512   ;;  %vm9_vm1 = vcmask 1048512   ;;  %vm15_vm2 = vcmask 982912   ;;  %vm21_vm3 = vcmask 917312   ;;  %s207_s0 = inlined_call_operand.vmem [shape: f32[16,8], index: 0, kind: input, shape index: {}]   ;;  %s208_s1 = inlined_call_operand.vmem [shape: f32[128], index: 1, kind: output, shape index: {}]  }
   0x1   :  { %v101_v0 = vld [vmem:[%s207_s0 + $0xf] sm:$0x1]   ;;  %v103_v1 = vld [vmem:[%s207_s0 + $0xd] sm:$0x1]   ;;  %v105_v2 = vld [vmem:[%s207_s0 + $0xb] sm:$0x1]  }
   0x2   :  { %7 = vrot.lane.b32.xlu0 %v101_v0, %s131_s10  ;;  %19 = vrot.lane.b32.xlu1 %v103_v1, %s132_s11  ;;  %s133_s14 = smov 88   ;;  %v102_v3 = vld [vmem:[%s207_s0 + $0xe] sm:$0x1]   ;;  %v104_v4 = vld [vmem:[%s207_s0 + $0xc] sm:$0x1]   ;;  %s134_s19 = smov 112  }
   0x3   :  { %31 = vrot.lane.b32.xlu2 %v105_v2, %s133_s14  ;;  %s135_s20 = smov 96   ;;  %v106_v5 = vld [vmem:[%s207_s0 + $0xa] sm:$0x1]   ;;  %s136_s23 = smov 80   ;;  %v107_v6 = vld [vmem:[%s207_s0 + $0x9] sm:$0x1]  }
   0x4   :  { %v108_v7 = vld [vmem:[%s207_s0 + $0x8] sm:$0x1]   ;;  %s137_s28 = smov 72   ;;  %s138_s29 = smov 64   ;;  %v109_v8 = vld [vmem:[%s207_s0 + $0x7] sm:$0x1]  }
   0x5   :  { %s139_s3 = smov 56   ;;  %v110_v9 = vld [vmem:[%s207_s0 + $0x6] sm:$0x1]   ;;  %v111_v10 = vld [vmem:[%s207_s0 + $0x5] sm:$0x1]   ;;  %s140_s8 = smov 48  }
   0x6   :  { %s141_s9 = smov 40   ;;  %v112_v11 = vld [vmem:[%s207_s0 + $0x4] sm:$0x1]   ;;  %s142_s12 = smov 32   ;;  %v113_v12 = vld [vmem:[%s207_s0 + $0x3] sm:$0x1]  }
   0x7   :  { %v114_v13 = vld [vmem:[%s207_s0 + $0x2] sm:$0x1]   ;;  %s143_s17 = smov 24   ;;  %s144_s18 = smov 16   ;;  %v115_v14 = vld [vmem:[%s207_s0 + $0x1] sm:$0x1]  }
   0x8   :  { %s145_s21 = smov 8   ;;  %v2_v15 = vld [vmem:[%s207_s0] sm:$0x1]   ;;  %vm27_vm4 = vcmask 851712   ;;  %vm33_vm5 = vcmask 786112   ;;  %vm39_vm6 = vcmask 720512  }
   0x9   :  { %4 = vst.msk [vmem:[#allocation0] sm:$0x1] %vm3_vm0, %v2_v15   ;;  %vm45_vm7 = vcmask 654912   ;;  %vm51_vm8 = vcmask 589312   ;;  %vm57_vm9 = vcmask 523712   ;;  %vm63_vm10 = vcmask 458112  }
   0xa   :  { %13 = vrot.lane.b32.xlu0 %v102_v3, %s134_s19  ;;  %25 = vrot.lane.b32.xlu1 %v104_v4, %s135_s20  ;;  %vm69_vm11 = vcmask 392512   ;;  %vm75_vm12 = vcmask 326912   ;;  %vm81_vm13 = vcmask 261312   ;;  %vm87_vm14 = vcmask 195712  }
   0xb   :  { %37 = vrot.lane.b32.xlu2 %v106_v5, %s136_s23  ;;  %vm93_vm15 = vcmask 130112  }
  0x12   :  { %43 = vrot.lane.b32.xlu0 %v107_v6, %s137_s28  ;;  %49 = vrot.lane.b32.xlu1 %v108_v7, %s138_s29 }
  0x13   :  { %55 = vrot.lane.b32.xlu2 %v109_v8, %s139_s3 }
  0x1a   :  { %61 = vrot.lane.b32.xlu0 %v110_v9, %s140_s8  ;;  %67 = vrot.lane.b32.xlu1 %v111_v10, %s141_s9 }
  0x1b   :  { %73 = vrot.lane.b32.xlu2 %v112_v11, %s142_s12 }
  0x22   :  { %79 = vrot.lane.b32.xlu0 %v113_v12, %s143_s17  ;;  %85 = vrot.lane.b32.xlu1 %v114_v13, %s144_s18 }
  0x23   :  { %91 = vrot.lane.b32.xlu2 %v115_v14, %s145_s21 }
  0x5d   :  { %v32_v16 = vpop.permute.xlu2 %31  }
  0x65   :  { %v38_v17 = vpop.permute.xlu2 %37  }
  0x6d   :  { %v56_v18 = vpop.permute.xlu2 %55  }
  0x74   :  { %v8_v19 = vpop.permute.xlu0 %7   ;;  %v20_v20 = vpop.permute.xlu1 %19  }
  0x75   :  { %10 = vst.msk [vmem:[#allocation0] sm:$0x1] %vm9_vm1, %v8_v19   ;;  %v74_v21 = vpop.permute.xlu2 %73  }
  0x7c   :  { %v14_v22 = vpop.permute.xlu0 %13   ;;  %v26_v23 = vpop.permute.xlu1 %25  }
  0x7d   :  { %16 = vst.msk [vmem:[#allocation0] sm:$0x1] %vm15_vm2, %v14_v22   ;;  %v92_v24 = vpop.permute.xlu2 %91  }
  0x7e   :  { %22 = vst.msk [vmem:[#allocation0] sm:$0x1] %vm21_vm3, %v20_v20  }
  0x7f   :  { %28 = vst.msk [vmem:[#allocation0] sm:$0x1] %vm27_vm4, %v26_v23  }
  0x80   :  { %34 = vst.msk [vmem:[#allocation0] sm:$0x1] %vm33_vm5, %v32_v16  }
  0x81   :  { %40 = vst.msk [vmem:[#allocation0] sm:$0x1] %vm39_vm6, %v38_v17  }
  0x84   :  { %v44_v25 = vpop.permute.xlu0 %43   ;;  %v50_v26 = vpop.permute.xlu1 %49  }
  0x85   :  { %46 = vst.msk [vmem:[#allocation0] sm:$0x1] %vm45_vm7, %v44_v25  }
  0x86   :  { %52 = vst.msk [vmem:[#allocation0] sm:$0x1] %vm51_vm8, %v50_v26  }
  0x87   :  { %58 = vst.msk [vmem:[#allocation0] sm:$0x1] %vm57_vm9, %v56_v18  }
  0x8c   :  { %v62_v27 = vpop.permute.xlu0 %61   ;;  %v68_v28 = vpop.permute.xlu1 %67  }
  0x8d   :  { %64 = vst.msk [vmem:[#allocation0] sm:$0x1] %vm63_vm10, %v62_v27  }
  0x8e   :  { %70 = vst.msk [vmem:[#allocation0] sm:$0x1] %vm69_vm11, %v68_v28  }
  0x8f   :  { %76 = vst.msk [vmem:[#allocation0] sm:$0x1] %vm75_vm12, %v74_v21  }
  0x94   :  { %v80_v29 = vpop.permute.xlu0 %79   ;;  %v86_v30 = vpop.permute.xlu1 %85  }
  0x95   :  { %82 = vst.msk [vmem:[#allocation0] sm:$0x1] %vm81_vm13, %v80_v29  }
  0x96   :  { %88 = vst.msk [vmem:[#allocation0] sm:$0x1] %vm87_vm14, %v86_v30  }
  0x97   :  { %94 = vst.msk [vmem:[#allocation0] sm:$0x1] %vm93_vm15, %v92_v24  }
  0x9e   :  { %v97_v31 = vld [vmem:[#allocation0] sm:$0x1] }
  0x9f   :  { %100 = vst [vmem:[%s208_s1] sm:$0x1] %v97_v31 }

// kernel: st_conv_block.1
= control target key start
LH: loop header
LB: loop body
LE: loop exit
PB: predicated region body
PF: predicated region fallthrough
CT: control target
= control target key end

     0   :  { %vm92_vm0 = vcmask 523264   ;;  %vm317_vm13 = vcmask 1046528   ;;  %vm322_vm14 = vcmask 1045504   ;;  %s1365_s1 = inlined_call_operand.vmem [shape: f32[192,256], index: 1, kind: input, shape index: {}]   ;;  %s1366_s0 = inlined_call_operand.vmem [shape: f32[20,192], index: 0, kind: input, shape index: {}]   ;;  %s1367_s4 = inlined_call_operand.vmem [shape: f32[1,128], index: 4, kind: input, shape index: {}]   ;;  %s1368_s3 = inlined_call_operand.vmem [shape: f32[128,128], index: 3, kind: input, shape index: {}]   ;;  %s1369_s2 = inlined_call_operand.vmem [shape: f32[1,256], index: 2, kind: input, shape index: {}]   ;;  %s1370_s5 = inlined_call_operand.vmem [shape: f32[384,256], index: 5, kind: input, shape index: {}]   ;;  %s1371_s6 = inlined_call_operand.vmem [shape: f32[1,256], index: 6, kind: input, shape index: {}]   ;;  %s1372_s7 = inlined_call_operand.vmem [shape: f32[1,128], index: 7, kind: input, shape index: {}]   ;;  %s1373_s8 = inlined_call_operand.vmem [shape: f32[1,128], index: 8, kind: input, shape index: {}]   ;;  %s1374_s9 = inlined_call_operand.vmem [shape: f32[16,128], index: 9, kind: output, shape index: {}]  }
   0x1   :  { %v69_v0 = vld [vmem:[%s1365_s1 + $0xf8] sm:$0xff]  ;;  %v67_v1 = vld [vmem:[%s1365_s1 + $0xe8] sm:$0xff]  ;;  %v68_v10 = vld [vmem:[%s1365_s1 + $0xf0] sm:$0xff] }
   0x2   :  { %154 = vmatpush.msra.mxu2 %v69_v0  ;;  %v65_v2 = vld [vmem:[%s1365_s1 + $0xd8] sm:$0xff]  ;;  %v63_v4 = vld [vmem:[%s1365_s1 + $0xc8] sm:$0xff]  ;;  %102 = vmatpush.msra.mxu0 %v68_v10  ;;  %v66_v12 = vld [vmem:[%s1365_s1 + $0xe0] sm:$0xff] }
   0x3   :  { %v85_v3 = vld [vmem:[%s1365_s1 + $0x178] sm:$0xff]  ;;  %v83_v5 = vld [vmem:[%s1365_s1 + $0x168] sm:$0xff]  ;;  %v64_v14 = vld [vmem:[%s1365_s1 + $0xd0] sm:$0xff] }
   0x4   :  { %155 = vmatpush.msra.mxu2 %v67_v1  ;;  %188 = vmatpush.msra.mxu3 %v85_v3  ;;  %v81_v6 = vld [vmem:[%s1365_s1 + $0x158] sm:$0xff]  ;;  %v79_v8 = vld [vmem:[%s1365_s1 + $0x148] sm:$0xff]  ;;  %v62_v17 = vld [vmem:[%s1365_s1 + $0xc0] sm:$0xff] }
   0x5   :  { %v61_v7 = vld [vmem:[%s1365_s1 + $0xb8] sm:$0xff]  ;;  %v59_v9 = vld [vmem:[%s1365_s1 + $0xa8] sm:$0xff]  ;;  %103 = vmatpush.msra.mxu0 %v66_v12  ;;  %v60_v20 = vld [vmem:[%s1365_s1 + $0xb0] sm:$0xff] }
   0x6   :  { %156 = vmatpush.msra.mxu2 %v65_v2  ;;  %189 = vmatpush.msra.mxu3 %v83_v5  ;;  %v77_v11 = vld [vmem:[%s1365_s1 + $0x138] sm:$0xff]  ;;  %v75_v15 = vld [vmem:[%s1365_s1 + $0x128] sm:$0xff]  ;;  %v58_v24 = vld [vmem:[%s1365_s1 + $0xa0] sm:$0xff] }
   0x7   :  { %v57_v13 = vld [vmem:[%s1365_s1 + $0x98] sm:$0xff]  ;;  %v55_v16 = vld [vmem:[%s1365_s1 + $0x88] sm:$0xff]  ;;  %104 = vmatpush.msra.mxu0 %v64_v14  ;;  %v84_v25 = vld [vmem:[%s1365_s1 + $0x170] sm:$0xff] }
   0x8   :  { %157 = vmatpush.msra.mxu2 %v63_v4  ;;  %190 = vmatpush.msra.mxu3 %v81_v6  ;;  %v73_v18 = vld [vmem:[%s1365_s1 + $0x118] sm:$0xff]  ;;  %v71_v21 = vld [vmem:[%s1365_s1 + $0x108] sm:$0xff]  ;;  %v82_v27 = vld [vmem:[%s1365_s1 + $0x160] sm:$0xff] }
   0x9   :  { %v53_v19 = vld [vmem:[%s1365_s1 + $0x78] sm:$0xff]  ;;  %105 = vmatpush.msra.mxu0 %v62_v17  ;;  %v51_v22 = vld [vmem:[%s1365_s1 + $0x68] sm:$0xff]  ;;  %136 = vmatpush.msra.mxu1 %v84_v25  ;;  %v56_v28 = vld [vmem:[%s1365_s1 + $0x90] sm:$0xff] }
   0xa   :  { %158 = vmatpush.msra.mxu2 %v61_v7  ;;  %191 = vmatpush.msra.mxu3 %v79_v8  ;;  %v33_v23 = vld [vmem:[%s1366_s0 + $0x8] sm:$0xff]  ;;  %v49_v26 = vld [vmem:[%s1365_s1 + $0x58] sm:$0xff]  ;;  %v80_v29 = vld [vmem:[%s1365_s1 + $0x150] sm:$0xff] }
   0xb   :  { %106 = vmatpush.msra.mxu0 %v60_v20  ;;  %v47_v30 = vld [vmem:[%s1365_s1 + $0x48] sm:$0xff]  ;;  %137 = vmatpush.msra.mxu1 %v82_v27  ;;  %v54_v31 = vld [vmem:[%s1365_s1 + $0x80] sm:$0xff]  ;;  %v45_v33 = vld [vmem:[%s1365_s1 + $0x38] sm:$0xff] }
   0xc   :  { %159 = vmatpush.msra.mxu2 %v59_v9  ;;  %192 = vmatpush.msra.mxu3 %v77_v11  ;;  %v78_v32 = vld [vmem:[%s1365_s1 + $0x140] sm:$0xff]  ;;  %v52_v34 = vld [vmem:[%s1365_s1 + $0x70] sm:$0xff]  ;;  %v43_v36 = vld [vmem:[%s1365_s1 + $0x28] sm:$0xff] }
   0xd   :  { %107 = vmatpush.msra.mxu0 %v58_v24  ;;  %138 = vmatpush.msra.mxu1 %v80_v29  ;;  %v76_v35 = vld [vmem:[%s1365_s1 + $0x130] sm:$0xff]  ;;  %v35_v37 = vld [vmem:[%s1366_s0 + $0x18] sm:$0xff]  ;;  %v50_v38 = vld [vmem:[%s1365_s1 + $0x60] sm:$0xff] }
   0xe   :  { %160 = vmatpush.msra.mxu2 %v57_v13  ;;  %193 = vmatpush.msra.mxu3 %v75_v15  ;;  %v74_v39 = vld [vmem:[%s1365_s1 + $0x120] sm:$0xff]  ;;  %v41_v40 = vld [vmem:[%s1365_s1 + $0x18] sm:$0xff]  ;;  %v48_v41 = vld [vmem:[%s1365_s1 + $0x50] sm:$0xff] }
   0xf   :  { %108 = vmatpush.msra.mxu0 %v56_v28  ;;  %139 = vmatpush.msra.mxu1 %v78_v32  ;;  %v72_v42 = vld [vmem:[%s1365_s1 + $0x110] sm:$0xff]  ;;  %v39_v43 = vld [vmem:[%s1365_s1 + $0x8] sm:$0xff]  ;;  %v32_v44 = vld [vmem:[%s1366_s0] sm:$0xff] }
  0x10   :  { %161 = vmatpush.msra.mxu2 %v55_v16  ;;  %194 = vmatpush.msra.mxu3 %v73_v18  ;;  %v46_v45 = vld [vmem:[%s1365_s1 + $0x40] sm:$0xff]  ;;  %v44_v47 = vld [vmem:[%s1365_s1 + $0x30] sm:$0xff]  ;;  %v37_v48 = vld [vmem:[%s1366_s0 + $0x28] sm:$0xf] }
  0x11   :  { %109 = vmatpush.msra.mxu0 %v54_v31  ;;  %140 = vmatpush.msra.mxu1 %v76_v35  ;;  %v70_v46 = vld [vmem:[%s1365_s1 + $0x100] sm:$0xff]  ;;  %v40_v50 = vld [vmem:[%s1365_s1 + $0x10] sm:$0xff]  ;;  %v281_v54 = vld [vmem:[%s1368_s3 + $0x78] sm:$0xff] }
  0x12   :  { %162 = vmatpush.msra.mxu2 %v53_v19  ;;  %195 = vmatpush.msra.mxu3 %v71_v21  ;;  %v42_v49 = vld [vmem:[%s1365_s1 + $0x20] sm:$0xff]  ;;  %v34_v51 = vld [vmem:[%s1366_s0 + $0x10] sm:$0xff]  ;;  %v279_v56 = vld [vmem:[%s1368_s3 + $0x68] sm:$0xff] }
  0x13   :  { %689 = vmatmul.msk.f32.vlgmr.msra.gmra.mxu3 %vm92_vm0, %v33_v23  ;;  %110 = vmatpush.msra.mxu0 %v52_v34  ;;  %v38_v52 = vld [vmem:[%s1365_s1] sm:$0xff]  ;;  %v280_v55 = vld [vmem:[%s1368_s3 + $0x70] sm:$0xff]  ;;  %v277_v58 = vld [vmem:[%s1368_s3 + $0x58] sm:$0xff] }
  0x14   :  { %163 = vmatpush.msra.mxu2 %v51_v22  ;;  %141 = vmatpush.msra.mxu1 %v74_v39  ;;  %v36_v53 = vld [vmem:[%s1366_s0 + $0x20] sm:$0xf]  ;;  %v276_v59 = vld [vmem:[%s1368_s3 + $0x50] sm:$0xff]  ;;  %v275_v60 = vld [vmem:[%s1368_s3 + $0x48] sm:$0xff] }
  0x15   :  { %111 = vmatpush.msra.mxu0 %v50_v38  ;;  %v278_v57 = vld [vmem:[%s1368_s3 + $0x60] sm:$0xff]  ;;  %v273_v62 = vld [vmem:[%s1368_s3 + $0x38] sm:$0xff]  ;;  %v272_v63 = vld [vmem:[%s1368_s3 + $0x30] sm:$0xff] }
  0x16   :  { %164 = vmatpush.msra.mxu2 %v49_v26  ;;  %142 = vmatpush.msra.mxu1 %v72_v42  ;;  %v274_v61 = vld [vmem:[%s1368_s3 + $0x40] sm:$0xff]  ;;  %v271_v0 = vld [vmem:[%s1368_s3 + $0x28] sm:$0xff]  ;;  %v269_v5 = vld [vmem:[%s1368_s3 + $0x18] sm:$0xff] }
  0x17   :  { %112 = vmatpush.msra.mxu0 %v48_v41  ;;  %v86_v1 = vld [vmem:[%s1369_s2] sm:$0x3]  ;;  %v268_v6 = vld [vmem:[%s1368_s3 + $0x10] sm:$0xff]  ;;  %v267_v9 = vld [vmem:[%s1368_s3 + $0x8] sm:$0xff] }
  0x18   :  { %165 = vmatpush.msra.mxu2 %v47_v30  ;;  %143 = vmatpush.msra.mxu1 %v70_v46  ;;  %v270_v2 = vld [vmem:[%s1368_s3 + $0x20] sm:$0xff]  ;;  %v89_v4 = vperm.slane %v86_v1, 1  ;;  %v371_v28 = vld [vmem:[%s1370_s5 + $0xf0] sm:$0xff]  ;;  %v372_v32 = vld [vmem:[%s1370_s5 + $0xf8] sm:$0xff]  ;;  %v1026_v35 = vperm.slane %v86_v1, 0 }
  0x19   :  { %113 = vmatpush.msra.mxu0 %v46_v45  ;;  %686 = vmatmul.msk.f32.vlgmr.msra.gmra.mxu1 %vm92_vm0, %v33_v23  ;;  %v266_v11 = vld [vmem:[%s1368_s3] sm:$0xff]  ;;  %v403_v30 = vld [vmem:[%s1370_s5 + $0x1f0] sm:$0xff]  ;;  %v370_v42 = vld [vmem:[%s1370_s5 + $0xe8] sm:$0xff] }
  0x1a   :  { %166 = vmatpush.msra.mxu2 %v45_v33  ;;  %286 = vmatpush.msrb.mxu1 %v281_v54  ;;  %v369_v29 = vld [vmem:[%s1370_s5 + $0xe0] sm:$0xff]  ;;  %v435_v31 = vld [vmem:[%s1370_s5 + $0x2f0] sm:$0xff] }
  0x1b   :  { %690 = vmatmul.msk.f32.gmra.mxu3 %vm92_vm0, %v35_v37  ;;  %114 = vmatpush.msra.mxu0 %v44_v47  ;;  %v433_v38 = vld [vmem:[%s1370_s5 + $0x2e0] sm:$0xff]  ;;  %v368_v47 = vld [vmem:[%s1370_s5 + $0xd8] sm:$0xff]  ;;  %v395_v54 = vld [vmem:[%s1370_s5 + $0x1b0] sm:$0xff] }
  0x1c   :  { %167 = vmatpush.msra.mxu2 %v43_v36  ;;  %287 = vmatpush.msrb.mxu1 %v280_v55  ;;  %v367_v36 = vld [vmem:[%s1370_s5 + $0xd0] sm:$0xff]  ;;  %v365_v46 = vld [vmem:[%s1370_s5 + $0xc0] sm:$0xff] }
  0x1d   :  { %115 = vmatpush.msra.mxu0 %v42_v49  ;;  %443 = vmatpush.msrb.mxu3 %v371_v28  ;;  %v429_v49 = vld [vmem:[%s1370_s5 + $0x2c0] sm:$0xff] }
  0x1e   :  { %168 = vmatpush.msra.mxu2 %v41_v40  ;;  %288 = vmatpush.msrb.mxu1 %v279_v56  ;;  %v427_v56 = vld [vmem:[%s1370_s5 + $0x2b0] sm:$0xff]  ;;  %v353_v28 = vld [vmem:[%s1370_s5 + $0x60] sm:$0xff] }
  0x1f   :  { %116 = vmatpush.msra.mxu0 %v40_v50  ;;  %444 = vmatpush.msrb.mxu3 %v369_v29  ;;  %v356_v29 = vld [vmem:[%s1370_s5 + $0x78] sm:$0xff] }
  0x20   :  { %169 = vmatpush.msra.mxu2 %v39_v43  ;;  %289 = vmatpush.msrb.mxu1 %v278_v57  ;;  %v399_v43 = vld [vmem:[%s1370_s5 + $0x1d0] sm:$0xff]  ;;  %v364_v57 = vld [vmem:[%s1370_s5 + $0xb8] sm:$0xff] }
  0x21   :  { %170 = vmatmul.f32.vlgmr.msra.gmra.mxu2 %v32_v44  ;;  %117 = vmatpush.msra.mxu0 %v38_v52  ;;  %v363_v52 = vld [vmem:[%s1370_s5 + $0xb0] sm:$0xff] }
  0x22   :  { %118 = vmatmul.f32.vlgmr.msra.gmra.mxu0 %v32_v44  ;;  %687 = vmatmul.msk.f32.gmra.mxu1 %vm92_vm0, %v35_v37  ;;  %v401_v37 = vld [vmem:[%s1370_s5 + $0x1e0] sm:$0xff]  ;;  %v431_v44 = vld [vmem:[%s1370_s5 + $0x2d0] sm:$0xff] }
  0x23   :  { %691 = vmatmul.msk.f32.gmra.mxu3 %vm92_vm0, %v37_v48  ;;  %290 = vmatpush.msrb.mxu1 %v277_v58 }
  0x24   :  { %466 = vmatpush.msrb.mxu0 %v403_v30  ;;  %489 = vmatpush.msrb.mxu2 %v435_v31  ;;  %v385_v30 = vld [vmem:[%s1370_s5 + $0x160] sm:$0xff] }
  0x25   :  { %291 = vmatpush.msrb.mxu1 %v276_v59  ;;  %445 = vmatpush.msrb.mxu3 %v367_v36  ;;  %v417_v31 = vld [vmem:[%s1370_s5 + $0x260] sm:$0xff]  ;;  %v354_v36 = vld [vmem:[%s1370_s5 + $0x68] sm:$0xff] }
  0x26   :  { %467 = vmatpush.msrb.mxu0 %v401_v37  ;;  %490 = vmatpush.msrb.mxu2 %v433_v38 }
  0x27   :  { %292 = vmatpush.msrb.mxu1 %v275_v60  ;;  %446 = vmatpush.msrb.mxu3 %v365_v46  ;;  %v361_v60 = vld [vmem:[%s1370_s5 + $0xa0] sm:$0xff] }
  0x28   :  { %468 = vmatpush.msrb.mxu0 %v399_v43  ;;  %491 = vmatpush.msrb.mxu2 %v431_v44  ;;  %v349_v44 = vld [vmem:[%s1370_s5 + $0x40] sm:$0xff] }
  0x29   :  { %173 = vmatmul.f32.gmra.mxu2 %v34_v51  ;;  %293 = vmatpush.msrb.mxu1 %v274_v61  ;;  %v393_v61 = vld [vmem:[%s1370_s5 + $0x1a0] sm:$0xff] }
  0x2a   :  { %121 = vmatmul.f32.gmra.mxu0 %v34_v51  ;;  %688 = vmatmul.msk.f32.gmra.mxu1 %vm92_vm0, %v37_v48  ;;  %v397_v48 = vld [vmem:[%s1370_s5 + $0x1c0] sm:$0xff] }
  0x2b   :  { %294 = vmatpush.msrb.mxu1 %v273_v62  ;;  %469 = vmatpush.msrb.mxu0 %v397_v48 }
  0x2c   :  { %492 = vmatpush.msrb.mxu2 %v429_v49  ;;  %447 = vmatpush.msrb.mxu3 %v363_v52  ;;  %v413_v52 = vld [vmem:[%s1370_s5 + $0x240] sm:$0xff] }
  0x2d   :  { %295 = vmatpush.msrb.mxu1 %v272_v63  ;;  %470 = vmatpush.msrb.mxu0 %v395_v54  ;;  %v425_v63 = vld [vmem:[%s1370_s5 + $0x2a0] sm:$0xff] }
  0x2e   :  { %493 = vmatpush.msrb.mxu2 %v427_v56  ;;  %448 = vmatpush.msrb.mxu3 %v361_v60  ;;  %v348_v60 = vld [vmem:[%s1370_s5 + $0x38] sm:$0xff] }
  0x2f   :  { %296 = vmatpush.msrb.mxu1 %v271_v0  ;;  %v362_v0 = vld [vmem:[%s1370_s5 + $0xa8] sm:$0xff]  ;;  %471 = vmatpush.msrb.mxu0 %v393_v61  ;;  %v377_v61 = vld [vmem:[%s1370_s5 + $0x120] sm:$0xff] }
  0x30   :  { %494 = vmatpush.msrb.mxu2 %v425_v63 }
  0x31   :  { %176 = vmatmul.f32.gmra.mxu2 %v36_v53  ;;  %297 = vmatpush.msrb.mxu1 %v270_v2 }
  0x32   :  { %124 = vmatmul.f32.gmra.mxu0 %v36_v53  ;;  %v366_v53 = vld [vmem:[%s1370_s5 + $0xc8] sm:$0xff] }
  0x33   :  { %298 = vmatpush.msrb.mxu1 %v269_v5  ;;  %v391_v5 = vld [vmem:[%s1370_s5 + $0x190] sm:$0xff] }
  0x34   :  { %472 = vmatpush.msrb.mxu0 %v391_v5 }
  0x35   :  { %299 = vmatpush.msrb.mxu1 %v268_v6 }
  0x37   :  { %300 = vmatpush.msrb.mxu1 %v267_v9  ;;  %v423_v9 = vld [vmem:[%s1370_s5 + $0x290] sm:$0xff] }
  0x38   :  { %495 = vmatpush.msrb.mxu2 %v423_v9  ;;  %v407_v9 = vld [vmem:[%s1370_s5 + $0x210] sm:$0xff] }
  0x39   :  { %301 = vmatpush.msrb.mxu1 %v266_v11 }
  0x3b   :  { %512 = vmatpush.msra.mxu1 %v372_v32 }
  0x3d   :  { %513 = vmatpush.msra.mxu1 %v370_v42 }
  0x3f   :  { %514 = vmatpush.msra.mxu1 %v368_v47  ;;  %v381_v47 = vld [vmem:[%s1370_s5 + $0x140] sm:$0xff] }
  0x41   :  { %515 = vmatpush.msra.mxu1 %v366_v53 }
  0x43   :  { %516 = vmatpush.msra.mxu1 %v364_v57 }
  0x45   :  { %517 = vmatpush.msra.mxu1 %v362_v0  ;;  %v343_v0 = vld [vmem:[%s1370_s5 + $0x10] sm:$0xff] }
  0x96   :  { %v197_v3 = vpop.f32.mrf.mxu3  ;;  %v145_v41 = vpop.f32.mrf.mxu1 }
  0x9e   :  { %v200_v13 = vpop.f32.mrf.mxu3 }
  0x9f   :  { %v119_v26 = vpop.f32.mrf.mxu0 }
  0xa0   :  { %v120_v50 = vadd.f32 %v119_v26, %v1026_v35 }
  0xa2   :  { %v146_v2 = vadd.f32 %v145_v41, %v120_v50  ;;  %v415_v41 = vld [vmem:[%s1370_s5 + $0x250] sm:$0xff] }
  0xa4   :  { %v171_v7 = vpop.f32.mrf.mxu2 }
  0xa5   :  { %v172_v8 = vadd.f32 %v171_v7, %v89_v4 }
  0xa6   :  { %v203_v23 = vpop.f32.mrf.mxu3 }
  0xa7   :  { %v198_v10 = vadd.f32 %v197_v3, %v172_v8  ;;  %v122_v62 = vpop.f32.mrf.mxu0 }
  0xa9   :  { %v206_v12 = vsub.f32 0.0, %v198_v10  ;;  %v360_v10 = vld [vmem:[%s1370_s5 + $0x98] sm:$0xff] }
  0xaa   :  { %518 = vmatpush.msra.mxu1 %v360_v10  ;;  %v404_v10 = vld [vmem:[%s1370_s5 + $0x1f8] sm:$0xff] }
  0xab   :  { %v209_v14 = vmul.f32 1.442695, %v206_v12 }
  0xac   :  { %v174_v15 = vpop.f32.mrf.mxu2 }
  0xad   :  { %712 = vpow2.f32 %v209_v14  ;;  %v175_v16 = vadd.f32 %v174_v15, %v89_v4  ;;  %v389_v14 = vld [vmem:[%s1370_s5 + $0x180] sm:$0xff] }
  0xae   :  { %473 = vmatpush.msrb.mxu0 %v389_v14  ;;  %v402_v14 = vld [vmem:[%s1370_s5 + $0x1e8] sm:$0xff] }
  0xaf   :  { %v201_v17 = vadd.f32 %v200_v13, %v175_v16  ;;  %v357_v13 = vld [vmem:[%s1370_s5 + $0x80] sm:$0xff]  ;;  %v148_v16 = vpop.f32.mrf.mxu1 }
  0xb1   :  { %v207_v18 = vsub.f32 0.0, %v201_v17  ;;  %v421_v17 = vld [vmem:[%s1370_s5 + $0x280] sm:$0xff] }
  0xb2   :  { %496 = vmatpush.msrb.mxu2 %v421_v17  ;;  %v400_v17 = vld [vmem:[%s1370_s5 + $0x1d8] sm:$0xff] }
  0xb3   :  { %v713_v19 = vpop.eup %712  ;;  %v211_v20 = vmul.f32 1.442695, %v207_v18 }
  0xb4   :  { %v1008_v21 = vadd.f32 1.0, %v713_v19  ;;  %v177_v22 = vpop.f32.mrf.mxu2  ;;  %v123_v19 = vadd.f32 %v122_v62, %v1026_v35 }
  0xb5   :  { %714 = vpow2.f32 %v211_v20  ;;  %v178_v24 = vadd.f32 %v177_v22, %v89_v4  ;;  %v359_v4 = vld [vmem:[%s1370_s5 + $0x90] sm:$0xff]  ;;  %v358_v22 = vld [vmem:[%s1370_s5 + $0x88] sm:$0xff] }
  0xb6   :  { %716 = vrcp.f32 %v1008_v21  ;;  %v229_v55 = vand.u32 2147483648, %v1008_v21  ;;  %v227_v59 = vand.u32 2147483647, %v1008_v21  ;;  %vm223_vm2 = vweird.f32 %v1008_v21  ;;  %449 = vmatpush.msrb.mxu3 %v359_v4  ;;  %519 = vmatpush.msra.mxu1 %v358_v22  ;;  %v430_v22 = vld [vmem:[%s1370_s5 + $0x2c8] sm:$0xff] }
  0xb7   :  { %v204_v25 = vadd.f32 %v203_v23, %v178_v24  ;;  %v387_v24 = vld [vmem:[%s1370_s5 + $0x170] sm:$0xff]  ;;  %v149_v32 = vadd.f32 %v148_v16, %v123_v19  ;;  %v151_v53 = vpop.f32.mrf.mxu1  ;;  %v436_v16 = vld [vmem:[%s1370_s5 + $0x2f8] sm:$0xff]  ;;  %v398_v19 = vld [vmem:[%s1370_s5 + $0x1c8] sm:$0xff] }
  0xb8   :  { %v230_v8 = vor.u32 1.1754944e-38, %v229_v55  ;;  %vm228_vm4 = vcmp.eq.f32.partialorder %v227_v59, 8.507059e+37  ;;  %450 = vmatpush.msrb.mxu3 %v357_v13  ;;  %474 = vmatpush.msrb.mxu0 %v387_v24  ;;  %v379_v55 = vld [vmem:[%s1370_s5 + $0x130] sm:$0xff]  ;;  %v405_v13 = vld [vmem:[%s1370_s5 + $0x200] sm:$0xff]  ;;  %v428_v24 = vld [vmem:[%s1370_s5 + $0x2b8] sm:$0xff] }
  0xb9   :  { %v208_v27 = vsub.f32 0.0, %v204_v25  ;;  %v419_v25 = vld [vmem:[%s1370_s5 + $0x270] sm:$0xff]  ;;  %520 = vmatpush.msra.mxu1 %v356_v29  ;;  %v388_v29 = vld [vmem:[%s1370_s5 + $0x178] sm:$0xff] }
  0xba   :  { %497 = vmatpush.msrb.mxu2 %v419_v25  ;;  %475 = vmatpush.msrb.mxu0 %v385_v30  ;;  %v411_v59 = vld [vmem:[%s1370_s5 + $0x230] sm:$0xff]  ;;  %v392_v25 = vld [vmem:[%s1370_s5 + $0x198] sm:$0xff]  ;;  %v422_v30 = vld [vmem:[%s1370_s5 + $0x288] sm:$0xff] }
  0xbb   :  { %v715_v33 = vpop.eup %714  ;;  %v213_v34 = vmul.f32 1.442695, %v208_v27  ;;  %521 = vmatpush.msra.mxu1 %v354_v36  ;;  %v382_v36 = vld [vmem:[%s1370_s5 + $0x148] sm:$0xff] }
  0xbc   :  { %v1037_v39 = vpop.eup %716  ;;  %v1039_v40 = vadd.f32 1.0, %v715_v33  ;;  %498 = vmatpush.msrb.mxu2 %v417_v31  ;;  %v386_v31 = vld [vmem:[%s1370_s5 + $0x168] sm:$0xff] }
  0xbd   :  { %718 = vpow2.f32 %v213_v34  ;;  %v219_v45 = vmul.f32 %v1037_v39, %v1008_v21  ;;  %vm224_vm1 = vweird.f32 %v1037_v39  ;;  %v355_v21 = vld [vmem:[%s1370_s5 + $0x70] sm:$0xff] }
  0xbe   :  { %720 = vrcp.f32 %v1039_v40  ;;  %vm225_vm3 = vmor %vm223_vm2, %vm224_vm1  ;;  %v244_v23 = vand.u32 2147483648, %v1039_v40  ;;  %v242_v27 = vand.u32 2147483647, %v1039_v40  ;;  %451 = vmatpush.msrb.mxu3 %v355_v21  ;;  %vm238_vm6 = vweird.f32 %v1039_v40  ;;  %v351_v34 = vld [vmem:[%s1370_s5 + $0x50] sm:$0xff]  ;;  %499 = vmatpush.msrb.mxu2 %v415_v41  ;;  %v396_v21 = vld [vmem:[%s1370_s5 + $0x1b8] sm:$0xff] }
  0xbf   :  { %v220_v51 = vsub.f32 1.0, %v219_v45  ;;  %v352_v45 = vld [vmem:[%s1370_s5 + $0x58] sm:$0xff] }
  0xc0   :  { %v245_v38 = vor.u32 1.1754944e-38, %v244_v23  ;;  %452 = vmatpush.msrb.mxu3 %v353_v28  ;;  %vm243_vm8 = vcmp.eq.f32.partialorder %v242_v27, 8.507059e+37  ;;  %522 = vmatpush.msra.mxu1 %v352_v45  ;;  %v394_v23 = vld [vmem:[%s1370_s5 + $0x1a8] sm:$0xff]  ;;  %v424_v28 = vld [vmem:[%s1370_s5 + $0x298] sm:$0xff] }
  0xc1   :  { %v221_v58 = vmul.f32 %v1037_v39, %v220_v51  ;;  %v347_v51 = vld [vmem:[%s1370_s5 + $0x30] sm:$0xff]  ;;  %500 = vmatpush.msrb.mxu2 %v413_v52  ;;  %v390_v27 = vld [vmem:[%s1370_s5 + $0x188] sm:$0xff]  ;;  %v412_v41 = vld [vmem:[%s1370_s5 + $0x238] sm:$0xff] }
  0xc2   :  { %453 = vmatpush.msrb.mxu3 %v351_v34  ;;  %v418_v34 = vld [vmem:[%s1370_s5 + $0x268] sm:$0xff] }
  0xc3   :  { %v719_v1 = vpop.eup %718  ;;  %v222_v3 = vadd.f32 %v1037_v39, %v221_v58  ;;  %v345_v58 = vld [vmem:[%s1370_s5 + $0x20] sm:$0xff]  ;;  %501 = vmatpush.msrb.mxu2 %v411_v59  ;;  %v374_v45 = vld [vmem:[%s1370_s5 + $0x108] sm:$0xff] }
  0xc4   :  { %v1105_v6 = vpop.eup %720  ;;  %v1107_v7 = vadd.f32 1.0, %v719_v1  ;;  %454 = vmatpush.msrb.mxu3 %v349_v44  ;;  %v409_v1 = vld [vmem:[%s1370_s5 + $0x220] sm:$0xff]  ;;  %v410_v44 = vld [vmem:[%s1370_s5 + $0x228] sm:$0xff] }
  0xc5   :  { %v226_v11 = vsel %vm225_vm3, %v1037_v39, %v222_v3  ;;  %v234_v12 = vmul.f32 %v1105_v6, %v1039_v40  ;;  %vm239_vm5 = vweird.f32 %v1105_v6  ;;  %v125_v39 = vpop.f32.mrf.mxu0  ;;  %v383_v40 = vld [vmem:[%s1370_s5 + $0x150] sm:$0xff]  ;;  %502 = vmatpush.msrb.mxu2 %v409_v1 }
  0xc6   :  { %722 = vrcp.f32 %v1107_v7  ;;  %v231_v15 = vsel %vm228_vm4, %v230_v8, %v226_v11  ;;  %vm240_vm7 = vmor %vm238_vm6, %vm239_vm5  ;;  %v126_v49 = vadd.f32 %v125_v39, %v1026_v35  ;;  %476 = vmatpush.msrb.mxu0 %v383_v40  ;;  %v259_v54 = vand.u32 2147483648, %v1107_v7  ;;  %v350_v35 = vld [vmem:[%s1370_s5 + $0x48] sm:$0xff]  ;;  %455 = vmatpush.msrb.mxu3 %v347_v51  ;;  %v375_v8 = vld [vmem:[%s1370_s5 + $0x110] sm:$0xff] }
  0xc7   :  { %v263_v18 = vmul.f32 %v231_v15, %v146_v2  ;;  %v235_v20 = vsub.f32 1.0, %v234_v12  ;;  %v257_v57 = vand.u32 2147483647, %v1107_v7  ;;  %vm253_vm10 = vweird.f32 %v1107_v7  ;;  %523 = vmatpush.msra.mxu1 %v350_v35  ;;  %503 = vmatpush.msrb.mxu2 %v407_v9  ;;  %v344_v11 = vld [vmem:[%s1370_s5 + $0x18] sm:$0xff]  ;;  %v373_v12 = vld [vmem:[%s1370_s5 + $0x100] sm:$0xff]  ;;  %v342_v15 = vld [vmem:[%s1370_s5 + $0x8] sm:$0xff] }
  0xc8   :  { %477 = vmatpush.msrb.mxu0 %v381_v47  ;;  %v152_v62 = vadd.f32 %v151_v53, %v126_v49  ;;  %v260_v2 = vor.u32 1.1754944e-38, %v259_v54  ;;  %456 = vmatpush.msrb.mxu3 %v345_v58  ;;  %v414_v39 = vld [vmem:[%s1370_s5 + $0x248] sm:$0xff]  ;;  %v408_v47 = vld [vmem:[%s1370_s5 + $0x218] sm:$0xff] }
  0xc9   :  { %302 = vmatmul.f32.vlgmr.msrb.gmra.mxu1 %v263_v18  ;;  %v236_v26 = vmul.f32 %v1105_v6, %v235_v20  ;;  %vm258_vm12 = vcmp.eq.f32.partialorder %v257_v57, 8.507059e+37  ;;  %504 = vmatpush.msrb.mxu2 %v405_v13  ;;  %v434_v18 = vld [vmem:[%s1370_s5 + $0x2e8] sm:$0xff]  ;;  %v432_v20 = vld [vmem:[%s1370_s5 + $0x2d8] sm:$0xff] }
  0xca   :  { %478 = vmatpush.msrb.mxu0 %v379_v55  ;;  %524 = vmatpush.msra.mxu1 %v348_v60  ;;  %v378_v40 = vld [vmem:[%s1370_s5 + $0x128] sm:$0xff] }
  0xcb   :  { %v237_v33 = vadd.f32 %v1105_v6, %v236_v26  ;;  %457 = vmatpush.msrb.mxu3 %v343_v0  ;;  %692 = vmatpush.msra.mxu2 %v436_v16  ;;  %v426_v26 = vld [vmem:[%s1370_s5 + $0x2a8] sm:$0xff] }
  0xcc   :  { %v723_v37 = vpop.eup %722  ;;  %479 = vmatpush.msrb.mxu0 %v377_v61  ;;  %v406_v49 = vld [vmem:[%s1370_s5 + $0x208] sm:$0xff] }
  0xcd   :  { %v241_v42 = vsel %vm240_vm7, %v1105_v6, %v237_v33  ;;  %v249_v43 = vmul.f32 %v723_v37, %v1107_v7  ;;  %vm254_vm9 = vweird.f32 %v723_v37  ;;  %v341_v6 = vld [vmem:[%s1370_s5] sm:$0xff]  ;;  %v346_v7 = vld [vmem:[%s1370_s5 + $0x28] sm:$0xff]  ;;  %693 = vmatpush.msra.mxu2 %v434_v18  ;;  %v384_v33 = vld [vmem:[%s1370_s5 + $0x158] sm:$0xff] }
  0xce   :  { %v246_v46 = vsel %vm243_vm8, %v245_v38, %v241_v42  ;;  %vm255_vm11 = vmor %vm253_vm10, %vm254_vm9  ;;  %458 = vmatpush.msrb.mxu3 %v341_v6  ;;  %525 = vmatpush.msra.mxu1 %v346_v7  ;;  %v380_v38 = vld [vmem:[%s1370_s5 + $0x138] sm:$0xff] }
  0xcf   :  { %v264_v48 = vmul.f32 %v246_v46, %v149_v32  ;;  %v250_v50 = vsub.f32 1.0, %v249_v43  ;;  %480 = vmatpush.msrb.mxu0 %v375_v8  ;;  %694 = vmatpush.msra.mxu2 %v432_v20  ;;  %v420_v32 = vld [vmem:[%s1370_s5 + $0x278] sm:$0xff]  ;;  %v709_v43 = vld [vmem:[%s1367_s4] ss:$0 sm:$0xff] }
  0xd0   :  { %535 = vmatpush.msra.mxu3 %v404_v10  ;;  %526 = vmatpush.msra.mxu1 %v344_v11  ;;  %v376_v42 = vld [vmem:[%s1370_s5 + $0x118] sm:$0xff]  ;;  %v437_v11 = vld [vmem:[%s1371_s6] sm:$0x3] }
  0xd1   :  { %305 = vmatmul.f32.gmra.mxu1 %v264_v48  ;;  %v251_v56 = vmul.f32 %v723_v37, %v250_v50  ;;  %481 = vmatpush.msrb.mxu0 %v373_v12 }
  0xd2   :  { %536 = vmatpush.msra.mxu3 %v402_v14  ;;  %527 = vmatpush.msra.mxu1 %v342_v15  ;;  %v440_v14 = vperm.slane %v437_v11, 1 }
  0xd3   :  { %v252_v63 = vadd.f32 %v723_v37, %v251_v56  ;;  %558 = vmatpush.msra.mxu0 %v436_v16  ;;  %695 = vmatpush.msra.mxu2 %v430_v22 }
  0xd4   :  { %537 = vmatpush.msra.mxu3 %v400_v17 }
  0xd5   :  { %v256_v3 = vsel %vm255_vm11, %v723_v37, %v252_v63  ;;  %559 = vmatpush.msra.mxu0 %v434_v18  ;;  %696 = vmatpush.msra.mxu2 %v428_v24  ;;  %v416_v37 = vld [vmem:[%s1370_s5 + $0x258] sm:$0xff] }
  0xd6   :  { %v261_v4 = vsel %vm258_vm12, %v260_v2, %v256_v3  ;;  %538 = vmatpush.msra.mxu3 %v398_v19 }
  0xd7   :  { %v265_v5 = vmul.f32 %v261_v4, %v152_v62  ;;  %560 = vmatpush.msra.mxu0 %v432_v20  ;;  %697 = vmatpush.msra.mxu2 %v426_v26 }
  0xd8   :  { %539 = vmatpush.msra.mxu3 %v396_v21 }
  0xd9   :  { %308 = vmatmul.f32.gmra.mxu1 %v265_v5  ;;  %561 = vmatpush.msra.mxu0 %v430_v22 }
  0xda   :  { %540 = vmatpush.msra.mxu3 %v394_v23  ;;  %698 = vmatpush.msra.mxu2 %v424_v28 }
  0xdb   :  { %562 = vmatpush.msra.mxu0 %v428_v24 }
  0xdc   :  { %541 = vmatpush.msra.mxu3 %v392_v25  ;;  %699 = vmatpush.msra.mxu2 %v422_v30 }
  0xdd   :  { %563 = vmatpush.msra.mxu0 %v426_v26 }
  0xde   :  { %542 = vmatpush.msra.mxu3 %v390_v27  ;;  %700 = vmatpush.msra.mxu2 %v420_v32 }
  0xdf   :  { %564 = vmatpush.msra.mxu0 %v424_v28 }
  0xe0   :  { %543 = vmatpush.msra.mxu3 %v388_v29  ;;  %701 = vmatpush.msra.mxu2 %v418_v34 }
  0xe1   :  { %565 = vmatpush.msra.mxu0 %v422_v30 }
  0xe2   :  { %544 = vmatpush.msra.mxu3 %v386_v31  ;;  %702 = vmatpush.msra.mxu2 %v416_v37 }
  0xe3   :  { %566 = vmatpush.msra.mxu0 %v420_v32 }
  0xe4   :  { %545 = vmatpush.msra.mxu3 %v384_v33  ;;  %703 = vmatpush.msra.mxu2 %v414_v39 }
  0xe5   :  { %567 = vmatpush.msra.mxu0 %v418_v34 }
  0xe6   :  { %546 = vmatpush.msra.mxu3 %v382_v36  ;;  %704 = vmatpush.msra.mxu2 %v412_v41 }
  0xe7   :  { %568 = vmatpush.msra.mxu0 %v416_v37  ;;  %v439_v37 = vperm.slane %v437_v11, 0 }
  0xe8   :  { %547 = vmatpush.msra.mxu3 %v380_v38  ;;  %705 = vmatpush.msra.mxu2 %v410_v44 }
  0xe9   :  { %569 = vmatpush.msra.mxu0 %v414_v39 }
  0xea   :  { %548 = vmatpush.msra.mxu3 %v378_v40  ;;  %706 = vmatpush.msra.mxu2 %v408_v47 }
  0xeb   :  { %570 = vmatpush.msra.mxu0 %v412_v41 }
  0xec   :  { %549 = vmatpush.msra.mxu3 %v376_v42  ;;  %707 = vmatpush.msra.mxu2 %v406_v49 }
  0xed   :  { %571 = vmatpush.msra.mxu0 %v410_v44 }
  0xee   :  { %550 = vmatpush.msra.mxu3 %v374_v45 }
  0xef   :  { %572 = vmatpush.msra.mxu0 %v408_v47 }
  0xf1   :  { %573 = vmatpush.msra.mxu0 %v406_v49 }
 0x146   :  { %v303_v46 = vpop.f32.mrf.mxu1 }
 0x147   :  { %v304_v48 = vadd.f32 %v709_v43, %v303_v46 }
 0x149   :  { %v312_v50 = vmax.f32 %v304_v48, 0.0 }
 0x14b   :  { %459 = vmatmul.f32.vlgmr.msrb.gmra.mxu3 %v312_v50  ;;  %528 = vmatmul.f32.vlgmr.msra.gmra.mxu1 %v312_v50  ;;  %v318_v55 = vrot.slane %v312_v50, 1  ;;  %v323_v56 = vrot.slane %v312_v50, 2 }
 0x14e   :  { %v306_v51 = vpop.f32.mrf.mxu1 }
 0x14f   :  { %v307_v52 = vadd.f32 %v709_v43, %v306_v51 }
 0x151   :  { %v313_v53 = vmax.f32 %v307_v52, 0.0 }
 0x153   :  { %v319_v54 = vrot.slane %v313_v53, 1  ;;  %v324_v35 = vrot.slane %v313_v53, 2 }
 0x155   :  { %v320_v57 = vsel %vm317_vm13, %v318_v55, %v319_v54  ;;  %v325_v58 = vsel %vm322_vm14, %v323_v56, %v324_v35 }
 0x156   :  { %v309_v59 = vpop.f32.mrf.mxu1  ;;  %482 = vmatmul.f32.vlgmr.msrb.gmra.mxu0 %v320_v57  ;;  %505 = vmatmul.f32.vlgmr.msrb.gmra.mxu2 %v325_v58 }
 0x157   :  { %v310_v60 = vadd.f32 %v709_v43, %v309_v59 }
 0x159   :  { %v314_v61 = vmax.f32 %v310_v60, 0.0 }
 0x15b   :  { %v328_v62 = vrot.slane %v314_v61, 1  ;;  %v330_v63 = vrot.slane %v314_v61, 2 }
 0x15d   :  { %v331_v0 = vsel %vm322_vm14, %v324_v35, %v330_v63  ;;  %v329_v1 = vsel %vm317_vm13, %v319_v54, %v328_v62  ;;  %v333_v2 = vrot.slane %v328_v62, 2  ;;  %v336_v3 = vrot.slane %v330_v63, 2 }
 0x15e   :  { %v335_v4 = vrot.slane %v331_v0, 2  ;;  %462 = vmatmul.f32.gmra.mxu3 %v331_v0  ;;  %531 = vmatmul.f32.gmra.mxu1 %v331_v0  ;;  %v332_v5 = vrot.slane %v329_v1, 2  ;;  %v738_v1 = vmov 128.0  }
 0x160   :  { %v334_v6 = vsel %vm322_vm14, %v332_v5, %v333_v2  ;;  %v337_v7 = vsel %vm322_vm14, %v335_v4, %v336_v3 }
 0x161   :  { %485 = vmatmul.f32.gmra.mxu0 %v334_v6  ;;  %508 = vmatmul.f32.gmra.mxu2 %v337_v7 }
 0x166   :  { %551 = vmatmul.f32.vlgmr.msra.gmra.mxu3 %v320_v57 }
 0x169   :  { %574 = vmatmul.f32.vlgmr.msra.gmra.mxu0 %v325_v58  ;;  %577 = vmatmul.f32.vlgmr.msra.gmra.mxu2 %v337_v7 }
 0x16e   :  { %554 = vmatmul.f32.gmra.mxu3 %v334_v6 }
 0x1c8   :  { %v529_v15 = vpop.f32.mrf.mxu1 }
 0x1c9   :  { %v530_v16 = vadd.f32 %v529_v15, %v440_v14 }
 0x1ce   :  { %v460_v8 = vpop.f32.mrf.mxu3 }
 0x1cf   :  { %v461_v41 = vadd.f32 %v460_v8, %v439_v37 }
 0x1d3   :  { %v483_v9 = vpop.f32.mrf.mxu0 }
 0x1d4   :  { %v484_v45 = vadd.f32 %v483_v9, %v461_v41 }
 0x1d9   :  { %v506_v10 = vpop.f32.mrf.mxu2 }
 0x1da   :  { %v507_v48 = vadd.f32 %v506_v10, %v484_v45 }
 0x1db   :  { %v532_v22 = vpop.f32.mrf.mxu1 }
 0x1dc   :  { %v533_v24 = vadd.f32 %v532_v22, %v440_v14 }
 0x1de   :  { %v486_v12 = vpop.f32.mrf.mxu0 }
 0x1e1   :  { %v463_v13 = vpop.f32.mrf.mxu3 }
 0x1e2   :  { %v464_v50 = vadd.f32 %v463_v13, %v439_v37 }
 0x1e4   :  { %v509_v17 = vpop.f32.mrf.mxu2  ;;  %v487_v56 = vadd.f32 %v486_v12, %v464_v50 }
 0x1e6   :  { %v575_v20 = vpop.f32.mrf.mxu0  ;;  %v510_v61 = vadd.f32 %v509_v17, %v487_v56 }
 0x1e9   :  { %v552_v18 = vpop.f32.mrf.mxu3 }
 0x1ea   :  { %v553_v19 = vadd.f32 %v552_v18, %v530_v16 }
 0x1ec   :  { %v576_v21 = vadd.f32 %v575_v20, %v553_v19  ;;  %v578_v28 = vpop.f32.mrf.mxu2 }
 0x1ee   :  { %v581_v23 = vsub.f32 0.0, %v576_v21 }
 0x1f0   :  { %v583_v25 = vmul.f32 1.442695, %v581_v23 }
 0x1f1   :  { %v555_v26 = vpop.f32.mrf.mxu3 }
 0x1f2   :  { %724 = vpow2.f32 %v583_v25  ;;  %v556_v27 = vadd.f32 %v555_v26, %v533_v24 }
 0x1f4   :  { %v579_v29 = vadd.f32 %v578_v28, %v556_v27 }
 0x1f6   :  { %v582_v30 = vsub.f32 0.0, %v579_v29 }
 0x1f8   :  { %v725_v31 = vpop.eup %724  ;;  %v585_v32 = vmul.f32 1.442695, %v582_v30  ;;  %v710_v30 = vld [vmem:[%s1372_s7] ss:$0 sm:$0xff] }
 0x1f9   :  { %v587_v33 = vadd.f32 1.0, %v725_v31 }
 0x1fa   :  { %726 = vpow2.f32 %v585_v32 }
 0x1fb   :  { %728 = vrcp.f32 %v587_v33  ;;  %v600_v42 = vand.u32 2147483648, %v587_v33  ;;  %v598_v44 = vand.u32 2147483647, %v587_v33  ;;  %vm594_vm0 = vweird.f32 %v587_v33 }
 0x1fd   :  { %v601_v49 = vor.u32 1.1754944e-38, %v600_v42  ;;  %vm599_vm2 = vcmp.eq.f32.partialorder %v598_v44, 8.507059e+37 }
 0x200   :  { %v727_v34 = vpop.eup %726 }
 0x201   :  { %v729_v36 = vpop.eup %728  ;;  %v588_v38 = vadd.f32 1.0, %v727_v34 }
 0x202   :  { %v590_v39 = vmul.f32 %v729_v36, %v587_v33  ;;  %vm595_vm15 = vweird.f32 %v729_v36  ;;  %v711_v33 = vld [vmem:[%s1373_s8] ss:$0 sm:$0xff] }
 0x203   :  { %730 = vrcp.f32 %v588_v38  ;;  %vm596_vm1 = vmor %vm594_vm0, %vm595_vm15  ;;  %v615_v55 = vand.u32 2147483648, %v588_v38  ;;  %v613_v58 = vand.u32 2147483647, %v588_v38  ;;  %vm609_vm4 = vweird.f32 %v588_v38 }
 0x204   :  { %v591_v40 = vsub.f32 1.0, %v590_v39  ;;  %732 = vrcp.f32 %v738_v1 }
 0x205   :  { %v616_v60 = vor.u32 1.1754944e-38, %v615_v55  ;;  %vm614_vm6 = vcmp.eq.f32.partialorder %v613_v58, 8.507059e+37 }
 0x206   :  { %v592_v43 = vmul.f32 %v729_v36, %v591_v40 }
 0x208   :  { %v593_v46 = vadd.f32 %v729_v36, %v592_v43 }
 0x209   :  { %v731_v47 = vpop.eup %730 }
 0x20a   :  { %v597_v51 = vsel %vm596_vm1, %v729_v36, %v593_v46  ;;  %v605_v52 = vmul.f32 %v731_v47, %v588_v38  ;;  %vm610_vm3 = vweird.f32 %v731_v47  ;;  %v733_v2 = vpop.eup %732 }
 0x20b   :  { %v602_v53 = vsel %vm599_vm2, %v601_v49, %v597_v51  ;;  %vm611_vm5 = vmor %vm609_vm4, %vm610_vm3  ;;  %v626_v3 = vmul.f32 128.0, %v733_v2  ;;  %vm630_vm7 = vweird.f32 %v733_v2 }
 0x20c   :  { %v619_v54 = vmul.f32 %v602_v53, %v507_v48  ;;  %v606_v35 = vsub.f32 1.0, %v605_v52 }
 0x20d   :  { %v627_v4 = vsub.f32 1.0, %v626_v3 }
 0x20e   :  { %621 = vadd.xlane.f32.xlu0 %v619_v54  ;;  %v607_v57 = vmul.f32 %v731_v47, %v606_v35 }
 0x20f   :  { %v628_v5 = vmul.f32 %v733_v2, %v627_v4 }
 0x210   :  { %v608_v59 = vadd.f32 %v731_v47, %v607_v57 }
 0x211   :  { %v629_v6 = vadd.f32 %v733_v2, %v628_v5 }
 0x212   :  { %v612_v62 = vsel %vm611_vm5, %v731_v47, %v608_v59 }
 0x213   :  { %v617_v63 = vsel %vm614_vm6, %v616_v60, %v612_v62  ;;  %v631_v7 = vsel %vm630_vm7, %v733_v2, %v629_v6 }
 0x214   :  { %v620_v0 = vmul.f32 %v617_v63, %v510_v61 }
 0x216   :  { %623 = vadd.xlane.f32.xlu0 %v620_v0 }
 0x281   :  { %v622_v8 = vpop.xlane.xlu0 %621 }
 0x282   :  { %v632_v9 = vmul.f32 %v631_v7, %v622_v8 }
 0x284   :  { %v634_v10 = vsub.f32 %v619_v54, %v632_v9 }
 0x286   :  { %v636_v11 = vmul.f32 %v634_v10, %v634_v10 }
 0x288   :  { %638 = vadd.xlane.f32.xlu1 %v636_v11 }
 0x289   :  { %v624_v12 = vpop.xlane.xlu0 %623 }
 0x28a   :  { %v633_v13 = vmul.f32 %v631_v7, %v624_v12 }
 0x28c   :  { %v635_v14 = vsub.f32 %v620_v0, %v633_v13 }
 0x28e   :  { %v637_v15 = vmul.f32 %v635_v14, %v635_v14 }
 0x290   :  { %640 = vadd.xlane.f32.xlu1 %v637_v15 }
 0x2fb   :  { %v639_v16 = vpop.xlane.xlu1 %638 }
 0x2fc   :  { %v642_v17 = vmul.f32 %v639_v16, %v631_v7 }
 0x2fe   :  { %v644_v18 = vadd.f32 1e-05, %v642_v17 }
 0x300   :  { %734 = vrsqrt.f32 %v644_v18  ;;  %vm652_vm9 = vweird.f32 %v644_v18 }
 0x303   :  { %v641_v19 = vpop.xlane.xlu1 %640 }
 0x304   :  { %v643_v20 = vmul.f32 %v641_v19, %v631_v7 }
 0x306   :  { %v735_v21 = vpop.eup %734  ;;  %v645_v22 = vadd.f32 1e-05, %v643_v20 }
 0x307   :  { %v647_v23 = vmul.f32 %v735_v21, %v644_v18  ;;  %vm653_vm8 = vweird.f32 %v735_v21 }
 0x308   :  { %736 = vrsqrt.f32 %v645_v22  ;;  %vm654_vm10 = vmor %vm652_vm9, %vm653_vm8  ;;  %vm662_vm12 = vweird.f32 %v645_v22 }
 0x309   :  { %v648_v24 = vmul.f32 %v735_v21, %v647_v23 }
 0x30b   :  { %v649_v25 = vmul.f32 0.5, %v648_v24 }
 0x30d   :  { %v650_v26 = vsub.f32 1.5, %v649_v25 }
 0x30e   :  { %v737_v27 = vpop.eup %736 }
 0x30f   :  { %v651_v28 = vmul.f32 %v735_v21, %v650_v26  ;;  %v657_v29 = vmul.f32 %v737_v27, %v645_v22  ;;  %vm663_vm11 = vweird.f32 %v737_v27 }
 0x310   :  { %vm664_vm13 = vmor %vm662_vm12, %vm663_vm11 }
 0x311   :  { %v655_v31 = vsel %vm654_vm10, %v735_v21, %v651_v28  ;;  %v658_v32 = vmul.f32 %v737_v27, %v657_v29 }
 0x312   :  { %v666_v34 = vmul.f32 %v655_v31, %v634_v10 }
 0x313   :  { %v659_v36 = vmul.f32 0.5, %v658_v32 }
 0x314   :  { %v672_v37 = vmul.f32 %v710_v30, %v666_v34 }
 0x315   :  { %v660_v38 = vsub.f32 1.5, %v659_v36 }
 0x316   :  { %v678_v39 = vadd.f32 %v711_v33, %v672_v37 }
 0x317   :  { %v661_v40 = vmul.f32 %v737_v27, %v660_v38 }
 0x318   :  { %680 = vst [vmem:[%s1374_s9] sm:$0xff] %v678_v39 }
 0x319   :  { %v665_v41 = vsel %vm664_vm13, %v737_v27, %v661_v40 }
 0x31a   :  { %v667_v42 = vmul.f32 %v665_v41, %v635_v14 }
 0x31c   :  { %v673_v43 = vmul.f32 %v710_v30, %v667_v42 }
 0x31e   :  { %v679_v44 = vadd.f32 %v711_v33, %v673_v43 }
 0x320   :  { %681 = vst [vmem:[%s1374_s9 + $0x8] sm:$0xff] %v679_v44 }

</bundles_post_ra>
